<compile_context>
chip_gen: v6e
topology: v6e:2x2x1
jax: 0.10.0
libtpu: 0.0.40
codegen_flags: <defaults>
</compile_context>

<pallas_src>
import functools

import jax
import jax.numpy as jnp
from jax.experimental import pallas as pl
from jax.experimental.pallas import tpu as pltpu


# --------------------------- Pallas kernel -----------------------------------

def _round_up(n, m):
    return ((n + m - 1) // m) * m


def fused_sr_kernel(xs_ref, x_ref, w_ref, b_ref, o_ref, *, c_dim, ss_true):
    """Fused spatial-mean + 1x1-conv (+ bias + mean) on one channel-planar block.

    Layout is channel-planar: (C, N, S_pad) with N = (#quadrants * batch) rows on
    sublanes and the flattened spatial axis padded to a multiple of 128 on lanes,
    so every load / FMA / store uses full (8, 128) vregs.

    xs_ref: (C, N, SS_PAD) VMEM  -- low-res son patches, lanes >= ss_true are zero
    x_ref : (C, N, SP_PAD) VMEM  -- input patches, zero-padded lanes
    w_ref : (C*C,)         SMEM  -- 1x1 conv weight, row-major w[o, c]
    b_ref : (C,)           SMEM  -- bias
    o_ref : (C, N, SP_PAD) VMEM
    """
    inv_ss = 1.0 / float(ss_true)
    for o in range(c_dim):
        # Per-sample spatial mean of the son patch at channel o.  Padded lanes are
        # zero so the sum is unbiased; divide by the TRUE spatial size.
        mean_o = jnp.sum(xs_ref[o], axis=-1, keepdims=True) * inv_ss + b_ref[o]  # (N, 1)
        # Channel mix as full-height broadcast-FMAs: each x_ref[c] is a contiguous
        # full-sublane (N, SP_PAD) tile; weights/bias are SMEM scalars.  C is tiny
        # (4), so VPU FMAs beat a padded 4x4 MXU matmul here.
        acc = x_ref[0] * w_ref[o * c_dim + 0]
        for c in range(1, c_dim):
            acc = acc + x_ref[c] * w_ref[o * c_dim + c]
        o_ref[o] = acc + mean_o                       # broadcast (N, 1) over lanes


# --------------------------- synthetic inner model ---------------------------

def synthetic_model_pallas(x_son_patch, x_patch, w_mat, bias, scale):
    """model(x_son, x) -> SR output of spatial size scale * x_patch spatial size."""
    B, C, hs, ws = x_son_patch.shape           # B = 4 * batch at the chop leaf
    _, _, hp, wp = x_patch.shape
    ss, sp = hs * ws, hp * wp
    ss_pad, sp_pad = _round_up(ss, 128), _round_up(sp, 128)

    # Channel-planar slabs (C, B, S): per-channel chunks become full-height (B, S)
    # tiles.  The transpose/pad is layout plumbing that fuses under jit with the
    # quadrant concatenate the caller already performs.
    xs_flat = x_son_patch.reshape(B, C, ss).transpose(1, 0, 2)   # (C, B, ss)
    x_flat = x_patch.reshape(B, C, sp).transpose(1, 0, 2)        # (C, B, sp)
    if ss_pad != ss:
        xs_flat = jnp.pad(xs_flat, ((0, 0), (0, 0), (0, ss_pad - ss)))
    if sp_pad != sp:
        x_flat = jnp.pad(x_flat, ((0, 0), (0, 0), (0, sp_pad - sp)))

    # Collapsed grid: one block on 1-TC chips; split into 2 "parallel" steps (v7x
    # megacore) only when the halves keep >=8-row (full-sublane) occupancy.  VMEM
    # is a non-constraint at these sizes (few MB double-buffered << 32 MiB scoped).
    n_blk = B // 2 if (B % 16 == 0) else B
    grid = (B // n_blk,)

    kernel = functools.partial(fused_sr_kernel, c_dim=C, ss_true=ss)
    y_flat = pl.pallas_call(
        kernel,
        out_shape=jax.ShapeDtypeStruct((C, B, sp_pad), jnp.float32),
        grid=grid,
        in_specs=[
            pl.BlockSpec((C, n_blk, ss_pad), lambda i: (0, i, 0)),
            pl.BlockSpec((C, n_blk, sp_pad), lambda i: (0, i, 0)),
            pl.BlockSpec(memory_space=pltpu.MemorySpace.SMEM),   # weights (C*C,)
            pl.BlockSpec(memory_space=pltpu.MemorySpace.SMEM),   # bias (C,)
        ],
        out_specs=pl.BlockSpec((C, n_blk, sp_pad), lambda i: (0, i, 0)),
        compiler_params=pltpu.CompilerParams(dimension_semantics=("parallel",)),
    )(xs_flat, x_flat, w_mat.reshape(-1), bias)

    y = y_flat[:, :, :sp].transpose(1, 0, 2).reshape(B, C, hp, wp)
    # Nearest-neighbor x`scale` upsample: pure data movement; XLA fuses it with the
    # stitching under jit.
    # TODO(synk): fold the 2x lane/row duplication into the kernel's output store if
    # a trace shows the repeat+stitch materializing a separate HBM slab.
    y = jnp.repeat(jnp.repeat(y, scale, axis=2), scale, axis=3)
    return y


def synthetic_model_ref(x_son_patch, x_patch, w_mat, bias, scale):
    """Pure-jnp reference of the same synthetic model (for verification)."""
    mean = jnp.mean(x_son_patch, axis=(2, 3), keepdims=True)            # (B, C, 1, 1)
    y = jnp.einsum("oc,bchw->bohw", w_mat, x_patch) + bias[None, :, None, None] + mean
    y = jnp.repeat(jnp.repeat(y, scale, axis=2), scale, axis=3)
    return y


# --------------------------- Chop.forward ------------------------------------

def chop_forward(model_fn, x_son, x, scale, scale_s, shave=12, min_size=40000):
    # NUM_GPU = 1 in the original module; batching the 4 equal-shaped quadrant
    # patches along the batch axis is numerically identical (per-sample model)
    # and cuts kernel launches 4x.
    b, c, h_s, w_s = x_son.shape
    _, _, h, w = x.shape
    h_0, w_0 = h % scale_s, w % scale_s
    h_half_s, w_half_s = h_s // 2, w_s // 2
    h_half, w_half = h_half_s * scale_s, w_half_s * scale_s
    shave_s = shave // scale_s
    h_size_s, w_size_s = h_half_s + shave_s, w_half_s + shave_s
    h_size, w_size = h_size_s * scale_s, w_size_s * scale_s

    lr_list_s = [
        x_son[:, :, 0:h_size_s, 0:w_size_s],
        x_son[:, :, 0:h_size_s, w_s - w_size_s:w_s],
        x_son[:, :, h_s - h_size_s:h_s, 0:w_size_s],
        x_son[:, :, h_s - h_size_s:h_s, w_s - w_size_s:w_s],
    ]
    lr_list = [
        x[:, :, 0:h_size + h_0, 0:w_size + w_0],
        x[:, :, 0:h_size + h_0, w - w_size - w_0:w],
        x[:, :, h - h_size - h_0:h, 0:w_size + w_0],
        x[:, :, h - h_size - h_0:h, w - w_size - w_0:w],
    ]

    if w_size * h_size < min_size:
        # All 4 quadrant patches share the same shape -> batch into ONE fused call.
        xs_b = jnp.concatenate(lr_list_s, axis=0)     # (4b, c, h_size_s, w_size_s)
        x_b = jnp.concatenate(lr_list, axis=0)        # (4b, c, h_size+h_0, w_size+w_0)
        sr_b = model_fn(xs_b, x_b)
        sr_list = jnp.split(sr_b, 4, axis=0)
    else:
        sr_list = [
            chop_forward(model_fn, ps, p, scale, scale_s, shave=shave, min_size=min_size)
            for ps, p in zip(lr_list_s, lr_list)
        ]

    h, w = scale * h, scale * w
    h_half, w_half = scale * h_half, scale * w_half
    h_size, w_size = scale * h_size, scale * w_size
    h_0, w_0 = h_0 * scale, w_0 * scale

    # Equivalent to the in-place quadrant assignment in the PyTorch module.
    q0 = sr_list[0][:, :, 0:h_half, 0:w_half]
    q1 = sr_list[1][:, :, 0:h_half, w_size - w + w_half + w_0:w_size + w_0]
    q2 = sr_list[2][:, :, h_size - h + h_half + h_0:h_size + h_0, 0:w_half]
    q3 = sr_list[3][:, :, h_size - h + h_half + h_0:h_size + h_0,
                    w_size - w + w_half + w_0:w_size + w_0]
    top = jnp.concatenate([q0, q1], axis=3)
    bot = jnp.concatenate([q2, q3], axis=3)
    return jnp.concatenate([top, bot], axis=2)


# --------------------------- main ---------------------------------------------

if __name__ == "__main__":
    B, C = 2, 4
    H, W = 32, 32
    SCALE = 2                    # cfg.CONST.SCALE
    SCALE_S = 2 if SCALE == 4 else SCALE

    key = jax.random.PRNGKey(0)
    k1, k2, k3, k4 = jax.random.split(key, 4)
    x = jax.random.normal(k1, (B, C, H, W), dtype=jnp.float32)
    x_son = jax.random.normal(k2, (B, C, H // SCALE_S, W // SCALE_S), dtype=jnp.float32)

    # deterministic synthetic model parameters (1x1 conv weight + bias)
    w_mat = 0.1 * jax.random.normal(k3, (C, C), dtype=jnp.float32)
    bias = 0.01 * jax.random.normal(k4, (C,), dtype=jnp.float32)

    model_pallas = functools.partial(
        synthetic_model_pallas, w_mat=w_mat, bias=bias, scale=SCALE)
    model_ref = functools.partial(
        synthetic_model_ref, w_mat=w_mat, bias=bias, scale=SCALE)

    # The whole forward (recursion is shape-static) is jitted: slicing, transposes,
    # padding, upsample, stitching all fuse around the single Pallas call per level.
    @jax.jit
    def run_pallas(xs, xx):
        return chop_forward(model_pallas, xs, xx, SCALE, SCALE_S)

    @jax.jit
    def run_ref(xs, xx):
        return chop_forward(model_ref, xs, xx, SCALE, SCALE_S)

    out = jax.block_until_ready(run_pallas(x_son, x))
    assert out.shape == (B, C, SCALE * H, SCALE * W), out.shape

    # correctness check against pure-JAX reference of the same synthetic model
    out_ref = jax.block_until_ready(run_ref(x_son, x))
    assert jnp.allclose(out, out_ref, atol=1e-5, rtol=1e-5)

    print("KERNEL_OK")
</pallas_src>

<mosaic_0001>
module attributes {stable_mosaic.version = 11 : i64} {
  func.func @fused_sr_kernel(%arg0: i32, %arg1: memref<4x8x256xf32, #tpu.memory_space<vmem>>, %arg2: memref<4x8x896xf32, #tpu.memory_space<vmem>>, %arg3: memref<16xf32, #tpu.memory_space<smem>>, %arg4: memref<4xf32, #tpu.memory_space<smem>>, %arg5: memref<4x8x896xf32, #tpu.memory_space<vmem>>) attributes {dimension_semantics = [#tpu.dimension_semantics<parallel>], iteration_bounds = array<i64: 1>, scalar_prefetch = 0 : i64, scratch_operands = 0 : i64, tpu.core_type = #tpu.core_type<tc>, window_params = [{transform_indices = @transform_0, window_bounds = array<i64: 4, 8, 256>}, {transform_indices = @transform_1, window_bounds = array<i64: 4, 8, 896>}, {transform_indices = @transform_2, window_bounds = array<i64: 16>}, {transform_indices = @transform_3, window_bounds = array<i64: 4>}, {transform_indices = @transform_4, window_bounds = array<i64: 4, 8, 896>}]} {
    %c0 = arith.constant 0 : index
    %c0_0 = arith.constant 0 : index
    %c0_1 = arith.constant 0 : index
    %0 = vector.load %arg1[%c0, %c0_0, %c0_1] : memref<4x8x256xf32, #tpu.memory_space<vmem>>, vector<1x8x256xf32>
    %1 = vector.shape_cast %0 : vector<1x8x256xf32> to vector<8x256xf32>
    %cst = arith.constant dense<0.000000e+00> : vector<8xf32>
    %2 = vector.multi_reduction <add>, %1, %cst [1] : vector<8x256xf32> to vector<8xf32>
    %3 = vector.shape_cast %2 : vector<8xf32> to vector<8x1xf32>
    %cst_2 = arith.constant 0.00510204071 : f32
    %4 = vector.broadcast %cst_2 : f32 to vector<8x1xf32>
    %5 = arith.mulf %3, %4 : vector<8x1xf32>
    %c0_3 = arith.constant 0 : index
    %6 = memref.load %arg4[%c0_3] : memref<4xf32, #tpu.memory_space<smem>>
    %7 = vector.broadcast %6 : f32 to vector<8x1xf32>
    %8 = arith.addf %5, %7 : vector<8x1xf32>
    %c0_4 = arith.constant 0 : index
    %c0_5 = arith.constant 0 : index
    %c0_6 = arith.constant 0 : index
    %9 = vector.load %arg2[%c0_4, %c0_5, %c0_6] : memref<4x8x896xf32, #tpu.memory_space<vmem>>, vector<1x8x896xf32>
    %10 = vector.shape_cast %9 : vector<1x8x896xf32> to vector<8x896xf32>
    %c0_7 = arith.constant 0 : index
    %11 = memref.load %arg3[%c0_7] : memref<16xf32, #tpu.memory_space<smem>>
    %12 = vector.broadcast %11 : f32 to vector<8x896xf32>
    %13 = arith.mulf %10, %12 : vector<8x896xf32>
    %c1 = arith.constant 1 : index
    %c0_8 = arith.constant 0 : index
    %c0_9 = arith.constant 0 : index
    %14 = vector.load %arg2[%c1, %c0_8, %c0_9] : memref<4x8x896xf32, #tpu.memory_space<vmem>>, vector<1x8x896xf32>
    %15 = vector.shape_cast %14 : vector<1x8x896xf32> to vector<8x896xf32>
    %c1_10 = arith.constant 1 : index
    %16 = memref.load %arg3[%c1_10] : memref<16xf32, #tpu.memory_space<smem>>
    %17 = vector.broadcast %16 : f32 to vector<8x896xf32>
    %18 = arith.mulf %15, %17 : vector<8x896xf32>
    %19 = arith.addf %13, %18 : vector<8x896xf32>
    %c2 = arith.constant 2 : index
    %c0_11 = arith.constant 0 : index
    %c0_12 = arith.constant 0 : index
    %20 = vector.load %arg2[%c2, %c0_11, %c0_12] : memref<4x8x896xf32, #tpu.memory_space<vmem>>, vector<1x8x896xf32>
    %21 = vector.shape_cast %20 : vector<1x8x896xf32> to vector<8x896xf32>
    %c2_13 = arith.constant 2 : index
    %22 = memref.load %arg3[%c2_13] : memref<16xf32, #tpu.memory_space<smem>>
    %23 = vector.broadcast %22 : f32 to vector<8x896xf32>
    %24 = arith.mulf %21, %23 : vector<8x896xf32>
    %25 = arith.addf %19, %24 : vector<8x896xf32>
    %c3 = arith.constant 3 : index
    %c0_14 = arith.constant 0 : index
    %c0_15 = arith.constant 0 : index
    %26 = vector.load %arg2[%c3, %c0_14, %c0_15] : memref<4x8x896xf32, #tpu.memory_space<vmem>>, vector<1x8x896xf32>
    %27 = vector.shape_cast %26 : vector<1x8x896xf32> to vector<8x896xf32>
    %c3_16 = arith.constant 3 : index
    %28 = memref.load %arg3[%c3_16] : memref<16xf32, #tpu.memory_space<smem>>
    %29 = vector.broadcast %28 : f32 to vector<8x896xf32>
    %30 = arith.mulf %27, %29 : vector<8x896xf32>
    %31 = arith.addf %25, %30 : vector<8x896xf32>
    %32 = vector.broadcast %8 : vector<8x1xf32> to vector<8x896xf32>
    %33 = arith.addf %31, %32 : vector<8x896xf32>
    %c0_17 = arith.constant 0 : index
    %c0_18 = arith.constant 0 : index
    %c0_19 = arith.constant 0 : index
    %34 = vector.load %arg5[%c0_17, %c0_18, %c0_19] : memref<4x8x896xf32, #tpu.memory_space<vmem>>, vector<1x8x896xf32>
    %35 = vector.shape_cast %34 : vector<1x8x896xf32> to vector<8x896xf32>
    %36 = vector.shape_cast %33 : vector<8x896xf32> to vector<1x8x896xf32>
    tpu.vector_store %arg5[%c0_17, %c0_18, %c0_19], %36 {strides = array<i32>} : memref<4x8x896xf32, #tpu.memory_space<vmem>>, vector<1x8x896xf32>,
    %c1_20 = arith.constant 1 : index
    %c0_21 = arith.constant 0 : index
    %c0_22 = arith.constant 0 : index
    %37 = vector.load %arg1[%c1_20, %c0_21, %c0_22] : memref<4x8x256xf32, #tpu.memory_space<vmem>>, vector<1x8x256xf32>
    %38 = vector.shape_cast %37 : vector<1x8x256xf32> to vector<8x256xf32>
    %cst_23 = arith.constant dense<0.000000e+00> : vector<8xf32>
    %39 = vector.multi_reduction <add>, %38, %cst_23 [1] : vector<8x256xf32> to vector<8xf32>
    %40 = vector.shape_cast %39 : vector<8xf32> to vector<8x1xf32>
    %cst_24 = arith.constant 0.00510204071 : f32
    %41 = vector.broadcast %cst_24 : f32 to vector<8x1xf32>
    %42 = arith.mulf %40, %41 : vector<8x1xf32>
    %c1_25 = arith.constant 1 : index
    %43 = memref.load %arg4[%c1_25] : memref<4xf32, #tpu.memory_space<smem>>
    %44 = vector.broadcast %43 : f32 to vector<8x1xf32>
    %45 = arith.addf %42, %44 : vector<8x1xf32>
    %c0_26 = arith.constant 0 : index
    %c0_27 = arith.constant 0 : index
    %c0_28 = arith.constant 0 : index
    %46 = vector.load %arg2[%c0_26, %c0_27, %c0_28] : memref<4x8x896xf32, #tpu.memory_space<vmem>>, vector<1x8x896xf32>
    %47 = vector.shape_cast %46 : vector<1x8x896xf32> to vector<8x896xf32>
    %c4 = arith.constant 4 : index
    %48 = memref.load %arg3[%c4] : memref<16xf32, #tpu.memory_space<smem>>
    %49 = vector.broadcast %48 : f32 to vector<8x896xf32>
    %50 = arith.mulf %47, %49 : vector<8x896xf32>
    %c1_29 = arith.constant 1 : index
    %c0_30 = arith.constant 0 : index
    %c0_31 = arith.constant 0 : index
    %51 = vector.load %arg2[%c1_29, %c0_30, %c0_31] : memref<4x8x896xf32, #tpu.memory_space<vmem>>, vector<1x8x896xf32>
    %52 = vector.shape_cast %51 : vector<1x8x896xf32> to vector<8x896xf32>
    %c5 = arith.constant 5 : index
    %53 = memref.load %arg3[%c5] : memref<16xf32, #tpu.memory_space<smem>>
    %54 = vector.broadcast %53 : f32 to vector<8x896xf32>
    %55 = arith.mulf %52, %54 : vector<8x896xf32>
    %56 = arith.addf %50, %55 : vector<8x896xf32>
    %c2_32 = arith.constant 2 : index
    %c0_33 = arith.constant 0 : index
    %c0_34 = arith.constant 0 : index
    %57 = vector.load %arg2[%c2_32, %c0_33, %c0_34] : memref<4x8x896xf32, #tpu.memory_space<vmem>>, vector<1x8x896xf32>
    %58 = vector.shape_cast %57 : vector<1x8x896xf32> to vector<8x896xf32>
    %c6 = arith.constant 6 : index
    %59 = memref.load %arg3[%c6] : memref<16xf32, #tpu.memory_space<smem>>
    %60 = vector.broadcast %59 : f32 to vector<8x896xf32>
    %61 = arith.mulf %58, %60 : vector<8x896xf32>
    %62 = arith.addf %56, %61 : vector<8x896xf32>
    %c3_35 = arith.constant 3 : index
    %c0_36 = arith.constant 0 : index
    %c0_37 = arith.constant 0 : index
    %63 = vector.load %arg2[%c3_35, %c0_36, %c0_37] : memref<4x8x896xf32, #tpu.memory_space<vmem>>, vector<1x8x896xf32>
    %64 = vector.shape_cast %63 : vector<1x8x896xf32> to vector<8x896xf32>
    %c7 = arith.constant 7 : index
    %65 = memref.load %arg3[%c7] : memref<16xf32, #tpu.memory_space<smem>>
    %66 = vector.broadcast %65 : f32 to vector<8x896xf32>
    %67 = arith.mulf %64, %66 : vector<8x896xf32>
    %68 = arith.addf %62, %67 : vector<8x896xf32>
    %69 = vector.broadcast %45 : vector<8x1xf32> to vector<8x896xf32>
    %70 = arith.addf %68, %69 : vector<8x896xf32>
    %c1_38 = arith.constant 1 : index
    %c0_39 = arith.constant 0 : index
    %c0_40 = arith.constant 0 : index
    %71 = vector.load %arg5[%c1_38, %c0_39, %c0_40] : memref<4x8x896xf32, #tpu.memory_space<vmem>>, vector<1x8x896xf32>
    %72 = vector.shape_cast %71 : vector<1x8x896xf32> to vector<8x896xf32>
    %73 = vector.shape_cast %70 : vector<8x896xf32> to vector<1x8x896xf32>
    tpu.vector_store %arg5[%c1_38, %c0_39, %c0_40], %73 {strides = array<i32>} : memref<4x8x896xf32, #tpu.memory_space<vmem>>, vector<1x8x896xf32>,
    %c2_41 = arith.constant 2 : index
    %c0_42 = arith.constant 0 : index
    %c0_43 = arith.constant 0 : index
    %74 = vector.load %arg1[%c2_41, %c0_42, %c0_43] : memref<4x8x256xf32, #tpu.memory_space<vmem>>, vector<1x8x256xf32>
    %75 = vector.shape_cast %74 : vector<1x8x256xf32> to vector<8x256xf32>
    %cst_44 = arith.constant dense<0.000000e+00> : vector<8xf32>
    %76 = vector.multi_reduction <add>, %75, %cst_44 [1] : vector<8x256xf32> to vector<8xf32>
    %77 = vector.shape_cast %76 : vector<8xf32> to vector<8x1xf32>
    %cst_45 = arith.constant 0.00510204071 : f32
    %78 = vector.broadcast %cst_45 : f32 to vector<8x1xf32>
    %79 = arith.mulf %77, %78 : vector<8x1xf32>
    %c2_46 = arith.constant 2 : index
    %80 = memref.load %arg4[%c2_46] : memref<4xf32, #tpu.memory_space<smem>>
    %81 = vector.broadcast %80 : f32 to vector<8x1xf32>
    %82 = arith.addf %79, %81 : vector<8x1xf32>
    %c0_47 = arith.constant 0 : index
    %c0_48 = arith.constant 0 : index
    %c0_49 = arith.constant 0 : index
    %83 = vector.load %arg2[%c0_47, %c0_48, %c0_49] : memref<4x8x896xf32, #tpu.memory_space<vmem>>, vector<1x8x896xf32>
    %84 = vector.shape_cast %83 : vector<1x8x896xf32> to vector<8x896xf32>
    %c8 = arith.constant 8 : index
    %85 = memref.load %arg3[%c8] : memref<16xf32, #tpu.memory_space<smem>>
    %86 = vector.broadcast %85 : f32 to vector<8x896xf32>
    %87 = arith.mulf %84, %86 : vector<8x896xf32>
    %c1_50 = arith.constant 1 : index
    %c0_51 = arith.constant 0 : index
    %c0_52 = arith.constant 0 : index
    %88 = vector.load %arg2[%c1_50, %c0_51, %c0_52] : memref<4x8x896xf32, #tpu.memory_space<vmem>>, vector<1x8x896xf32>
    %89 = vector.shape_cast %88 : vector<1x8x896xf32> to vector<8x896xf32>
    %c9 = arith.constant 9 : index
    %90 = memref.load %arg3[%c9] : memref<16xf32, #tpu.memory_space<smem>>
    %91 = vector.broadcast %90 : f32 to vector<8x896xf32>
    %92 = arith.mulf %89, %91 : vector<8x896xf32>
    %93 = arith.addf %87, %92 : vector<8x896xf32>
    %c2_53 = arith.constant 2 : index
    %c0_54 = arith.constant 0 : index
    %c0_55 = arith.constant 0 : index
    %94 = vector.load %arg2[%c2_53, %c0_54, %c0_55] : memref<4x8x896xf32, #tpu.memory_space<vmem>>, vector<1x8x896xf32>
    %95 = vector.shape_cast %94 : vector<1x8x896xf32> to vector<8x896xf32>
    %c10 = arith.constant 10 : index
    %96 = memref.load %arg3[%c10] : memref<16xf32, #tpu.memory_space<smem>>
    %97 = vector.broadcast %96 : f32 to vector<8x896xf32>
    %98 = arith.mulf %95, %97 : vector<8x896xf32>
    %99 = arith.addf %93, %98 : vector<8x896xf32>
    %c3_56 = arith.constant 3 : index
    %c0_57 = arith.constant 0 : index
    %c0_58 = arith.constant 0 : index
    %100 = vector.load %arg2[%c3_56, %c0_57, %c0_58] : memref<4x8x896xf32, #tpu.memory_space<vmem>>, vector<1x8x896xf32>
    %101 = vector.shape_cast %100 : vector<1x8x896xf32> to vector<8x896xf32>
    %c11 = arith.constant 11 : index
    %102 = memref.load %arg3[%c11] : memref<16xf32, #tpu.memory_space<smem>>
    %103 = vector.broadcast %102 : f32 to vector<8x896xf32>
    %104 = arith.mulf %101, %103 : vector<8x896xf32>
    %105 = arith.addf %99, %104 : vector<8x896xf32>
    %106 = vector.broadcast %82 : vector<8x1xf32> to vector<8x896xf32>
    %107 = arith.addf %105, %106 : vector<8x896xf32>
    %c2_59 = arith.constant 2 : index
    %c0_60 = arith.constant 0 : index
    %c0_61 = arith.constant 0 : index
    %108 = vector.load %arg5[%c2_59, %c0_60, %c0_61] : memref<4x8x896xf32, #tpu.memory_space<vmem>>, vector<1x8x896xf32>
    %109 = vector.shape_cast %108 : vector<1x8x896xf32> to vector<8x896xf32>
    %110 = vector.shape_cast %107 : vector<8x896xf32> to vector<1x8x896xf32>
    tpu.vector_store %arg5[%c2_59, %c0_60, %c0_61], %110 {strides = array<i32>} : memref<4x8x896xf32, #tpu.memory_space<vmem>>, vector<1x8x896xf32>,
    %c3_62 = arith.constant 3 : index
    %c0_63 = arith.constant 0 : index
    %c0_64 = arith.constant 0 : index
    %111 = vector.load %arg1[%c3_62, %c0_63, %c0_64] : memref<4x8x256xf32, #tpu.memory_space<vmem>>, vector<1x8x256xf32>
    %112 = vector.shape_cast %111 : vector<1x8x256xf32> to vector<8x256xf32>
    %cst_65 = arith.constant dense<0.000000e+00> : vector<8xf32>
    %113 = vector.multi_reduction <add>, %112, %cst_65 [1] : vector<8x256xf32> to vector<8xf32>
    %114 = vector.shape_cast %113 : vector<8xf32> to vector<8x1xf32>
    %cst_66 = arith.constant 0.00510204071 : f32
    %115 = vector.broadcast %cst_66 : f32 to vector<8x1xf32>
    %116 = arith.mulf %114, %115 : vector<8x1xf32>
    %c3_67 = arith.constant 3 : index
    %117 = memref.load %arg4[%c3_67] : memref<4xf32, #tpu.memory_space<smem>>
    %118 = vector.broadcast %117 : f32 to vector<8x1xf32>
    %119 = arith.addf %116, %118 : vector<8x1xf32>
    %c0_68 = arith.constant 0 : index
    %c0_69 = arith.constant 0 : index
    %c0_70 = arith.constant 0 : index
    %120 = vector.load %arg2[%c0_68, %c0_69, %c0_70] : memref<4x8x896xf32, #tpu.memory_space<vmem>>, vector<1x8x896xf32>
    %121 = vector.shape_cast %120 : vector<1x8x896xf32> to vector<8x896xf32>
    %c12 = arith.constant 12 : index
    %122 = memref.load %arg3[%c12] : memref<16xf32, #tpu.memory_space<smem>>
    %123 = vector.broadcast %122 : f32 to vector<8x896xf32>
    %124 = arith.mulf %121, %123 : vector<8x896xf32>
    %c1_71 = arith.constant 1 : index
    %c0_72 = arith.constant 0 : index
    %c0_73 = arith.constant 0 : index
    %125 = vector.load %arg2[%c1_71, %c0_72, %c0_73] : memref<4x8x896xf32, #tpu.memory_space<vmem>>, vector<1x8x896xf32>
    %126 = vector.shape_cast %125 : vector<1x8x896xf32> to vector<8x896xf32>
    %c13 = arith.constant 13 : index
    %127 = memref.load %arg3[%c13] : memref<16xf32, #tpu.memory_space<smem>>
    %128 = vector.broadcast %127 : f32 to vector<8x896xf32>
    %129 = arith.mulf %126, %128 : vector<8x896xf32>
    %130 = arith.addf %124, %129 : vector<8x896xf32>
    %c2_74 = arith.constant 2 : index
    %c0_75 = arith.constant 0 : index
    %c0_76 = arith.constant 0 : index
    %131 = vector.load %arg2[%c2_74, %c0_75, %c0_76] : memref<4x8x896xf32, #tpu.memory_space<vmem>>, vector<1x8x896xf32>
    %132 = vector.shape_cast %131 : vector<1x8x896xf32> to vector<8x896xf32>
    %c14 = arith.constant 14 : index
    %133 = memref.load %arg3[%c14] : memref<16xf32, #tpu.memory_space<smem>>
    %134 = vector.broadcast %133 : f32 to vector<8x896xf32>
    %135 = arith.mulf %132, %134 : vector<8x896xf32>
    %136 = arith.addf %130, %135 : vector<8x896xf32>
    %c3_77 = arith.constant 3 : index
    %c0_78 = arith.constant 0 : index
    %c0_79 = arith.constant 0 : index
    %137 = vector.load %arg2[%c3_77, %c0_78, %c0_79] : memref<4x8x896xf32, #tpu.memory_space<vmem>>, vector<1x8x896xf32>
    %138 = vector.shape_cast %137 : vector<1x8x896xf32> to vector<8x896xf32>
    %c15 = arith.constant 15 : index
    %139 = memref.load %arg3[%c15] : memref<16xf32, #tpu.memory_space<smem>>
    %140 = vector.broadcast %139 : f32 to vector<8x896xf32>
    %141 = arith.mulf %138, %140 : vector<8x896xf32>
    %142 = arith.addf %136, %141 : vector<8x896xf32>
    %143 = vector.broadcast %119 : vector<8x1xf32> to vector<8x896xf32>
    %144 = arith.addf %142, %143 : vector<8x896xf32>
    %c3_80 = arith.constant 3 : index
    %c0_81 = arith.constant 0 : index
    %c0_82 = arith.constant 0 : index
    %145 = vector.load %arg5[%c3_80, %c0_81, %c0_82] : memref<4x8x896xf32, #tpu.memory_space<vmem>>, vector<1x8x896xf32>
    %146 = vector.shape_cast %145 : vector<1x8x896xf32> to vector<8x896xf32>
    %147 = vector.shape_cast %144 : vector<8x896xf32> to vector<1x8x896xf32>
    tpu.vector_store %arg5[%c3_80, %c0_81, %c0_82], %147 {strides = array<i32>} : memref<4x8x896xf32, #tpu.memory_space<vmem>>, vector<1x8x896xf32>,
    return
  }
  func.func @transform_0(%arg0: i32) -> (i32, i32, i32) {
    %c0_i32 = arith.constant 0 : i32
    %c0_i32_0 = arith.constant 0 : i32
    %c0_i32_1 = arith.constant 0 : i32
    return %c0_i32, %arg0, %c0_i32_0 : i32, i32, i32
  }
  func.func @transform_1(%arg0: i32) -> (i32, i32, i32) {
    %c0_i32 = arith.constant 0 : i32
    %c0_i32_0 = arith.constant 0 : i32
    %c0_i32_1 = arith.constant 0 : i32
    return %c0_i32, %arg0, %c0_i32_0 : i32, i32, i32
  }
  func.func @transform_2(%arg0: i32) -> i32 {
    %c0_i32 = arith.constant 0 : i32
    %c0_i32_0 = arith.constant 0 : i32
    return %c0_i32 : i32
  }
  func.func @transform_3(%arg0: i32) -> i32 {
    %c0_i32 = arith.constant 0 : i32
    %c0_i32_0 = arith.constant 0 : i32
    return %c0_i32 : i32
  }
  func.func @transform_4(%arg0: i32) -> (i32, i32, i32) {
    %c0_i32 = arith.constant 0 : i32
    %c0_i32_0 = arith.constant 0 : i32
    %c0_i32_1 = arith.constant 0 : i32
    return %c0_i32, %arg0, %c0_i32_0 : i32, i32, i32
  }
}

</mosaic_0001>

<bundles_post_ra>
// kernel: run_pallas.1
= control target key start
LH: loop header
LB: loop body
LE: loop exit
PB: predicated region body
PF: predicated region fallthrough
CT: control target
= control target key end

     0   :  { %9 = vsyncpa [#allocation3], 0  ;;  %s1169_s0 = inlined_call_operand.vmem [shape: f32[4,8,256], index: 0, kind: input, shape index: {}]   ;;  %s1170_s1 = inlined_call_operand.vmem [shape: f32[4,8,896], index: 1, kind: input, shape index: {}]   ;;  %s1171_s2 = inlined_call_operand.vmem [shape: f32[16], index: 2, kind: input, shape index: {}]   ;;  %s1172_s3 = inlined_call_operand.vmem [shape: f32[4], index: 3, kind: input, shape index: {}]   ;;  %s1173_s4 = inlined_call_operand.vmem [shape: f32[4,8,896], index: 4, kind: output, shape index: {}]  }
   0x1   :  { %s21_s17 = sshll.u32 %s1171_s2, 4  ;;  %s22_s17 = int_to_ptr.vmem [resolvable:$true] %s21_s17 }
   0x2   :  { %10 = vsyncpa [#allocation5], 0  ;;  %s31_s20 = sshll.u32 %s1172_s3, 4  ;;  %s620_s21 = scalar_lea.vmem %s22_s17, 16  ;;  %s32_s20 = int_to_ptr.vmem [resolvable:$true] %s31_s20 }
   0x3   :  { %p621_p0 = scmp.ne.s32.totalorder %s22_s17, %s620_s21  ;;  %p625_p1 = scmp.lt.s32.totalorder %s22_s17, %s22_s17 }
   0x4   :  { %p626_p2 = scmp.lt.s32.totalorder %s620_s21, %s620_s21 }
   0x6   :  { %p627_p3 = por %p626_p2, %p625_p1 }
   0x8   :  { %p628_p4 = pnand %p627_p3, %p621_p0 }
   0xa   :  { %631 = shalt.err (!%p628_p4)
}
   0xb   :  { %s648_s22 = smov [#allocation2]   ;;  %s632_s23 = scalar_lea.vmem %s32_s20, 16 }
   0xc   :  { %24 = dma.vmem_to_smem %s22_s17, 16, %s648_s22, [#allocation3]  }
   0xd   :  { %p633_p5 = scmp.ne.s32.totalorder %s32_s20, %s632_s23  ;;  %p637_p6 = scmp.lt.s32.totalorder %s32_s20, %s32_s20 }
   0xe   :  { %p638_p7 = scmp.lt.s32.totalorder %s632_s23, %s632_s23 }
  0x10   :  { %p639_p8 = por %p638_p7, %p637_p6 }
  0x12   :  { %p640_p9 = pnand %p639_p8, %p633_p5 }
  0x14   :  { %643 = shalt.err (!%p640_p9)
}
  0x15   :  { %s649_s2 = smov [#allocation4]  }
  0x16   :  { %34 = dma.vmem_to_smem %s32_s20, 16, %s649_s2, [#allocation5]  }
  0x17   :  { %644 = dma.done.wait [#allocation3], 16  }
  0x18   :  { %645 = vsyncadd [#allocation3], 4294967280 }
  0x19   :  { %646 = dma.done.wait [#allocation5], 16  }
  0x1a   :  { %647 = vsyncadd [#allocation5], 4294967280 }
  0x1b   :  { %41 = sfence }
  0x1c   :  { %v548_v0 = vld [vmem:[%s1169_s0 + $0x20] sm:$0xff]  ;;  %v549_v1 = vld [vmem:[%s1169_s0 + $0x28] sm:$0xff]  ;;  %v583_v5 = vld [vmem:[%s1169_s0 + $0x30] sm:$0xff]  ;;  %s551_s13 = sld [smem:[#allocation2 + $0x8]] }
  0x1d   :  { %v42_v2 = vld [vmem:[%s1169_s0] sm:$0xff]  ;;  %v266_v3 = vadd.f32 %v549_v1, %v548_v0  ;;  %v43_v4 = vld [vmem:[%s1169_s0 + $0x8] sm:$0xff]  ;;  %v584_v6 = vld [vmem:[%s1169_s0 + $0x38] sm:$0xff]  ;;  %s559_s14 = sld [smem:[#allocation2 + $0x9]] }
  0x1e   :  { %v44_v7 = vadd.f32 %v43_v4, %v42_v2  ;;  %v513_v8 = vld [vmem:[%s1169_s0 + $0x10] sm:$0xff]  ;;  %v514_v9 = vld [vmem:[%s1169_s0 + $0x18] sm:$0xff]  ;;  %v376_v10 = vadd.f32 %v584_v6, %v583_v5  ;;  %s705_s15 = sld [smem:[#allocation2 + $0xa]]  ;;  %v710_v12 = vld [vmem:[%s1170_s1] sm:$0xff] }
  0x1f   :  { %267 = vadd.xlane.f32.xlu1 %v266_v3  ;;  %v156_v11 = vadd.f32 %v514_v9, %v513_v8  ;;  %v715_v13 = vld [vmem:[%s1170_s1 + $0x8] sm:$0xff]  ;;  %v720_v14 = vld [vmem:[%s1170_s1 + $0x10] sm:$0xff]  ;;  %v725_v16 = vld [vmem:[%s1170_s1 + $0x38] sm:$0xff]  ;;  %s747_s29 = sld [smem:[#allocation4 + $0x2]] }
  0x20   :  { %45 = vadd.xlane.f32.xlu0 %v44_v7  ;;  %v730_v17 = vld [vmem:[%s1170_s1 + $0x40] sm:$0xff]  ;;  %v735_v19 = vld [vmem:[%s1170_s1 + $0x18] sm:$0xff]  ;;  %v740_v20 = vld [vmem:[%s1170_s1 + $0x48] sm:$0xff]  ;;  %s783_s17 = sld [smem:[#allocation2 + $0xb]] }
  0x21   :  { %v745_v21 = vld [vmem:[%s1170_s1 + $0x50] sm:$0xff]  ;;  %v752_v22 = vld [vmem:[%s1170_s1 + $0x20] sm:$0xff]  ;;  %v757_v23 = vld [vmem:[%s1170_s1 + $0x28] sm:$0xff]  ;;  %s789_s18 = sld [smem:[#allocation2]] }
  0x22   :  { %v281_v15 = vstv %s551_s13  ;;  %v762_v24 = vld [vmem:[%s1170_s1 + $0x58] sm:$0xff]  ;;  %v767_v25 = vld [vmem:[%s1170_s1 + $0x30] sm:$0xff]  ;;  %v774_v28 = vld [vmem:[%s1170_s1 + $0x60] sm:$0xff]  ;;  %s804_s22 = sld [smem:[#allocation2 + $0x1]] }
  0x23   :  { %377 = vadd.xlane.f32.xlu1 %v376_v10  ;;  %v297_v18 = vstv %s559_s14  ;;  %1177 = vst [vmem:[#allocation8_spill] sm:$0xff] %v767_v25  ;;  %v282_v26 = vmul.f32 %v281_v15, %v710_v12  ;;  %v283_v27 = vmul.f32 %v281_v15, %v715_v13  ;;  %1178 = vst [vmem:[#allocation9_spill] sm:$0xff] %v774_v28  ;;  %v779_v29 = vld [vmem:[%s1170_s1 + $0x68] sm:$0xff]  ;;  %v796_v38 = vld [vmem:[%s1170_s1 + $0x70] sm:$0xff]  ;;  %s835_s5 = sld [smem:[#allocation2 + $0x2]] }
  0x24   :  { %157 = vadd.xlane.f32.xlu0 %v156_v11  ;;  %v298_v30 = vmul.f32 %v725_v16, %v297_v18  ;;  %v299_v31 = vmul.f32 %v730_v17, %v297_v18  ;;  %v284_v32 = vmul.f32 %v281_v15, %v720_v14  ;;  %v285_v33 = vmul.f32 %v281_v15, %v735_v19  ;;  %v801_v39 = vld [vmem:[%s1170_s1 + $0x78] sm:$0xff]  ;;  %v813_v45 = vld [vmem:[%s1170_s1 + $0x80] sm:$0xff]  ;;  %v818_v46 = vld [vmem:[%s1170_s1 + $0x88] sm:$0xff]  ;;  %s886_s20 = sld [smem:[#allocation4]] }
  0x25   :  { %v300_v34 = vmul.f32 %v740_v20, %v297_v18  ;;  %v301_v35 = vmul.f32 %v745_v21, %v297_v18  ;;  %v286_v36 = vmul.f32 %v281_v15, %v752_v22  ;;  %v302_v37 = vmul.f32 %v762_v24, %v297_v18  ;;  %v823_v47 = vld [vmem:[%s1170_s1 + $0x90] sm:$0xff]  ;;  %v828_v50 = vld [vmem:[%s1170_s1 + $0x98] sm:$0xff]  ;;  %v833_v51 = vld [vmem:[%s1170_s1 + $0xa0] sm:$0xff]  ;;  %s895_s21 = sld [smem:[#allocation2 + $0x3]] }
  0x26   :  { %v320_v40 = vstv %s705_s15  ;;  %v287_v41 = vmul.f32 %v281_v15, %v757_v23  ;;  %v288_v42 = vmul.f32 %v281_v15, %v767_v25  ;;  %v303_v43 = vmul.f32 %v774_v28, %v297_v18  ;;  %v847_v0 = vld [vmem:[%s1170_s1 + $0xa8] sm:$0xff]  ;;  %v852_v1 = vld [vmem:[%s1170_s1 + $0xb0] sm:$0xff]  ;;  %v859_v6 = vld [vmem:[%s1170_s1 + $0xb8] sm:$0xff]  ;;  %s918_s23 = sld [smem:[#allocation4 + $0x3]] }
  0x27   :  { %v304_v44 = vmul.f32 %v779_v29, %v297_v18  ;;  %v305_v48 = vadd.f32 %v298_v30, %v282_v26  ;;  %v306_v49 = vadd.f32 %v299_v31, %v283_v27  ;;  %v307_v52 = vadd.f32 %v300_v34, %v284_v32  ;;  %v866_v26 = vld [vmem:[%s1170_s1 + $0xc0] sm:$0xff]  ;;  %v873_v31 = vld [vmem:[%s1170_s1 + $0xc8] sm:$0xff]  ;;  %v878_v32 = vld [vmem:[%s1170_s1 + $0xd0] sm:$0xff]  ;;  %s932_s2 = sld [smem:[#allocation2 + $0xe]] }
  0x28   :  { %v308_v53 = vadd.f32 %v301_v35, %v285_v33  ;;  %v321_v54 = vmul.f32 %v796_v38, %v320_v40  ;;  %v322_v55 = vmul.f32 %v801_v39, %v320_v40  ;;  %v309_v56 = vadd.f32 %v302_v37, %v286_v36  ;;  %v883_v33 = vld [vmem:[%s1170_s1 + $0xd8] sm:$0xff]  ;;  %s905_s1 = sld [smem:[#allocation2 + $0xc]] }
  0x29   :  { %v323_v57 = vmul.f32 %v813_v45, %v320_v40  ;;  %v324_v58 = vmul.f32 %v818_v46, %v320_v40  ;;  %v325_v59 = vmul.f32 %v823_v47, %v320_v40  ;;  %v310_v60 = vadd.f32 %v303_v43, %v287_v41  ;;  %s954_s3 = sld [smem:[#allocation2 + $0xf]] }
  0x2a   :  { %v311_v61 = vadd.f32 %v304_v44, %v288_v42  ;;  %v326_v62 = vmul.f32 %v828_v50, %v320_v40  ;;  %v327_v63 = vmul.f32 %v833_v51, %v320_v40  ;;  %v343_v2 = vstv %s783_s17  ;;  %s961_s24 = sld [smem:[#allocation2 + $0x4]] }
  0x2b   :  { %v328_v4 = vadd.f32 %v321_v54, %v305_v48  ;;  %v329_v5 = vadd.f32 %v322_v55, %v306_v49  ;;  %v59_v7 = vstv %s789_s18  ;;  %v330_v8 = vadd.f32 %v323_v57, %v307_v52  ;;  %s967_s15 = sld [smem:[#allocation2 + $0x5]] }
  0x2c   :  { %v331_v9 = vadd.f32 %v324_v58, %v308_v53  ;;  %v332_v10 = vadd.f32 %v325_v59, %v309_v56  ;;  %v76_v11 = vstv %s804_s22  ;;  %v333_v15 = vadd.f32 %v326_v62, %v310_v60  ;;  %s913_s22 = sld [smem:[#allocation2 + $0xd]] }
  0x2d   :  { %v334_v18 = vadd.f32 %v327_v63, %v311_v61  ;;  %v344_v27 = vmul.f32 %v847_v0, %v343_v2  ;;  %v345_v30 = vmul.f32 %v852_v1, %v343_v2  ;;  %v346_v34 = vmul.f32 %v859_v6, %v343_v2  ;;  %s977_s25 = sld [smem:[#allocation2 + $0x6]] }
  0x2e   :  { %v60_v35 = vmul.f32 %v710_v12, %v59_v7  ;;  %v61_v36 = vmul.f32 %v715_v13, %v59_v7  ;;  %v100_v37 = vstv %s835_s5  ;;  %v62_v40 = vmul.f32 %v720_v14, %v59_v7  ;;  %s1004_s26 = sld [smem:[#allocation4 + $0x1]] }
  0x2f   :  { %v63_v41 = vmul.f32 %v735_v19, %v59_v7  ;;  %v64_v42 = vmul.f32 %v752_v22, %v59_v7  ;;  %v77_v43 = vmul.f32 %v725_v16, %v76_v11  ;;  %v78_v44 = vmul.f32 %v730_v17, %v76_v11  ;;  %s1011_s27 = sld [smem:[#allocation2 + $0x7]] }
  0x30   :  { %v79_v48 = vmul.f32 %v740_v20, %v76_v11  ;;  %v80_v49 = vmul.f32 %v745_v21, %v76_v11  ;;  %v81_v52 = vmul.f32 %v762_v24, %v76_v11  ;;  %v347_v53 = vmul.f32 %v866_v26, %v343_v2 }
  0x31   :  { %v348_v54 = vmul.f32 %v873_v31, %v343_v2  ;;  %v349_v55 = vmul.f32 %v878_v32, %v343_v2  ;;  %v350_v56 = vmul.f32 %v883_v33, %v343_v2  ;;  %v907_v57 = vadd.f32 %v344_v27, %v328_v4 }
  0x32   :  { %v909_v58 = vadd.f32 %v345_v30, %v329_v5  ;;  %v65_v59 = vmul.f32 %v757_v23, %v59_v7  ;;  %v82_v60 = vmul.f32 %v774_v28, %v76_v11  ;;  %v66_v61 = vmul.f32 %v767_v25, %v59_v7 }
  0x33   :  { %1179 = vst [vmem:[#allocation10_spill] sm:$0xff] %v907_v57  ;;  %v83_v62 = vmul.f32 %v779_v29, %v76_v11  ;;  %v84_v63 = vadd.f32 %v77_v43, %v60_v35  ;;  %v101_v2 = vmul.f32 %v796_v38, %v100_v37  ;;  %v85_v3 = vadd.f32 %v78_v44, %v61_v36 }
  0x34   :  { %1180 = vst [vmem:[#allocation11_spill] sm:$0xff] %v909_v58  ;;  %v86_v4 = vadd.f32 %v79_v48, %v62_v40  ;;  %v87_v27 = vadd.f32 %v80_v49, %v63_v41  ;;  %v88_v5 = vadd.f32 %v81_v52, %v64_v42  ;;  %v102_v30 = vmul.f32 %v801_v39, %v100_v37 }
  0x35   :  { %v103_v58 = vmul.f32 %v813_v45, %v100_v37  ;;  %v104_v57 = vmul.f32 %v818_v46, %v100_v37  ;;  %v105_v7 = vmul.f32 %v823_v47, %v100_v37  ;;  %v924_v28 = vadd.f32 %v346_v34, %v330_v8 }
  0x36   :  { %v89_v35 = vadd.f32 %v82_v60, %v65_v59  ;;  %v106_v36 = vmul.f32 %v828_v50, %v100_v37  ;;  %v928_v40 = vadd.f32 %v347_v53, %v331_v9  ;;  %v90_v41 = vadd.f32 %v83_v62, %v66_v61 }
  0x37   :  { %1181 = vst [vmem:[#allocation12_spill] sm:$0xff] %v924_v28  ;;  %v107_v42 = vmul.f32 %v833_v51, %v100_v37  ;;  %v124_v43 = vstv %s895_s21  ;;  %v934_v44 = vadd.f32 %v348_v54, %v332_v10  ;;  %v936_v48 = vadd.f32 %v349_v55, %v333_v15 }
  0x38   :  { %1182 = vst [vmem:[#allocation13_spill] sm:$0xff] %v928_v40  ;;  %v938_v8 = vadd.f32 %v350_v56, %v334_v18  ;;  %v108_v34 = vadd.f32 %v101_v2, %v84_v63  ;;  %v109_v49 = vadd.f32 %v102_v30, %v85_v3  ;;  %v110_v52 = vadd.f32 %v103_v58, %v86_v4 }
  0x39   :  { %1183 = vst [vmem:[#allocation14_spill] sm:$0xff] %v934_v44  ;;  %1184 = vst [vmem:[#allocation15_spill] sm:$0xff] %v936_v48  ;;  %v111_v59 = vadd.f32 %v104_v57, %v87_v27  ;;  %v112_v9 = vadd.f32 %v105_v7, %v88_v5  ;;  %v113_v53 = vadd.f32 %v106_v36, %v89_v35  ;;  %v391_v61 = vstv %s905_s1 }
  0x3a   :  { %1185 = vst [vmem:[#allocation16_spill] sm:$0xff] %v938_v8  ;;  %v125_v60 = vmul.f32 %v847_v0, %v124_v43  ;;  %v407_v37 = vstv %s913_s22  ;;  %v114_v62 = vadd.f32 %v107_v42, %v90_v41  ;;  %v126_v11 = vmul.f32 %v852_v1, %v124_v43 }
  0x3b   :  { %v127_v10 = vmul.f32 %v859_v6, %v124_v43  ;;  %v128_v15 = vmul.f32 %v866_v26, %v124_v43  ;;  %v129_v18 = vmul.f32 %v873_v31, %v124_v43  ;;  %v130_v54 = vmul.f32 %v878_v32, %v124_v43 }
  0x3c   :  { %v131_v3 = vmul.f32 %v883_v33, %v124_v43  ;;  %v392_v56 = vmul.f32 %v391_v61, %v710_v12  ;;  %v393_v57 = vmul.f32 %v391_v61, %v715_v13  ;;  %v408_v58 = vmul.f32 %v725_v16, %v407_v37  ;;  %v1187_v43 = vld [vmem:[#allocation9_spill] sm:$0xff] }
  0x3d   :  { %v409_v63 = vmul.f32 %v730_v17, %v407_v37  ;;  %v956_v2 = vadd.f32 %v125_v60, %v108_v34  ;;  %v394_v4 = vmul.f32 %v391_v61, %v720_v14  ;;  %v395_v27 = vmul.f32 %v391_v61, %v735_v19 }
  0x3e   :  { %v410_v5 = vmul.f32 %v740_v20, %v407_v37  ;;  %v396_v30 = vmul.f32 %v391_v61, %v752_v22  ;;  %v411_v7 = vmul.f32 %v745_v21, %v407_v37  ;;  %v412_v35 = vmul.f32 %v762_v24, %v407_v37 }
  0x3f   :  { %1186 = vst [vmem:[#allocation17_spill] sm:$0xff] %v956_v2  ;;  %v430_v36 = vstv %s932_s2  ;;  %v397_v41 = vmul.f32 %v391_v61, %v757_v23  ;;  %v398_v42 = vmul.f32 %v391_v61, %v767_v25  ;;  %v413_v34 = vmul.f32 %v1187_v43, %v407_v37 }
  0x40   :  { %v414_v60 = vmul.f32 %v779_v29, %v407_v37  ;;  %v973_v55 = vadd.f32 %v126_v11, %v109_v49  ;;  %v975_v2 = vadd.f32 %v127_v10, %v110_v52  ;;  %v415_v8 = vadd.f32 %v408_v58, %v392_v56 }
  0x41   :  { %v416_v48 = vadd.f32 %v409_v63, %v393_v57  ;;  %v417_v44 = vadd.f32 %v410_v5, %v394_v4  ;;  %v431_v40 = vmul.f32 %v796_v38, %v430_v36  ;;  %v432_v28 = vmul.f32 %v801_v39, %v430_v36 }
  0x42   :  { %1188 = vst [vmem:[#allocation18_spill] sm:$0xff] %v975_v2  ;;  %v433_v61 = vmul.f32 %v813_v45, %v430_v36  ;;  %v418_v25 = vadd.f32 %v411_v7, %v395_v27  ;;  %v419_v43 = vadd.f32 %v412_v35, %v396_v30  ;;  %v434_v37 = vmul.f32 %v818_v46, %v430_v36 }
  0x43   :  { %v435_v11 = vmul.f32 %v823_v47, %v430_v36  ;;  %v420_v49 = vadd.f32 %v413_v34, %v397_v41  ;;  %v421_v52 = vadd.f32 %v414_v60, %v398_v42  ;;  %v436_v10 = vmul.f32 %v828_v50, %v430_v36 }
  0x44   :  { %v437_v56 = vmul.f32 %v833_v51, %v430_v36  ;;  %v986_v57 = vadd.f32 %v128_v15, %v111_v59  ;;  %v988_v58 = vadd.f32 %v129_v18, %v112_v9  ;;  %v990_v63 = vadd.f32 %v130_v54, %v113_v53 }
  0x45   :  { %v453_v4 = vstv %s954_s3  ;;  %v993_v27 = vadd.f32 %v131_v3, %v114_v62  ;;  %v438_v5 = vadd.f32 %v431_v40, %v415_v8  ;;  %v439_v30 = vadd.f32 %v432_v28, %v416_v48 }
  0x46   :  { %v440_v7 = vadd.f32 %v433_v61, %v417_v44  ;;  %v441_v35 = vadd.f32 %v434_v37, %v418_v25  ;;  %v442_v41 = vadd.f32 %v435_v11, %v419_v43  ;;  %v171_v42 = vstv %s961_s24  ;;  %v1189_v43 = vld [vmem:[#allocation8_spill] sm:$0xff] }
  0x47   :  { %v187_v34 = vstv %s967_s15  ;;  %v443_v60 = vadd.f32 %v436_v10, %v420_v49  ;;  %v997_v2 = vadd.f32 %v437_v56, %v421_v52  ;;  %v454_v59 = vmul.f32 %v847_v0, %v453_v4 }
  0x48   :  { %v455_v9 = vmul.f32 %v852_v1, %v453_v4  ;;  %v456_v53 = vmul.f32 %v859_v6, %v453_v4  ;;  %v457_v62 = vmul.f32 %v866_v26, %v453_v4  ;;  %v458_v15 = vmul.f32 %v873_v31, %v453_v4 }
  0x49   :  { %v210_v28 = vstv %s977_s25  ;;  %v172_v25 = vmul.f32 %v710_v12, %v171_v42  ;;  %v173_v40 = vmul.f32 %v715_v13, %v171_v42  ;;  %v174_v44 = vmul.f32 %v720_v14, %v171_v42 }
  0x4a   :  { %v188_v48 = vmul.f32 %v725_v16, %v187_v34  ;;  %v175_v8 = vmul.f32 %v735_v19, %v171_v42  ;;  %v189_v18 = vmul.f32 %v730_v17, %v187_v34  ;;  %v190_v54 = vmul.f32 %v740_v20, %v187_v34  ;;  %v1190_v19 = vld [vmem:[#allocation9_spill] sm:$0xff] }
  0x4b   :  { %v191_v3 = vmul.f32 %v745_v21, %v187_v34  ;;  %v459_v36 = vmul.f32 %v878_v32, %v453_v4  ;;  %v1019_v12 = vmul.f32 %v883_v33, %v453_v4  ;;  %v176_v13 = vmul.f32 %v752_v22, %v171_v42 }
  0x4c   :  { %v192_v14 = vmul.f32 %v762_v24, %v187_v34  ;;  %v177_v16 = vmul.f32 %v757_v23, %v171_v42  ;;  %v178_v61 = vmul.f32 %v1189_v43, %v171_v42  ;;  %v193_v37 = vmul.f32 %v1190_v19, %v187_v34  ;;  %v1195_v19 = vld [vmem:[#allocation12_spill] sm:$0xff] }
  0x4d   :  { %v194_v17 = vmul.f32 %v779_v29, %v187_v34  ;;  %v1027_v20 = vadd.f32 %v454_v59, %v438_v5  ;;  %v1029_v21 = vadd.f32 %v455_v9, %v439_v30  ;;  %v195_v11 = vadd.f32 %v188_v48, %v172_v25 }
  0x4e   :  { %v211_v49 = vmul.f32 %v796_v38, %v210_v28  ;;  %v196_v22 = vadd.f32 %v189_v18, %v173_v40  ;;  %v197_v52 = vadd.f32 %v190_v54, %v174_v44  ;;  %v198_v24 = vadd.f32 %v191_v3, %v175_v8 }
  0x4f   :  { %v212_v23 = vmul.f32 %v801_v39, %v210_v28  ;;  %v199_v10 = vadd.f32 %v192_v14, %v176_v13  ;;  %v213_v56 = vmul.f32 %v813_v45, %v210_v28  ;;  %v214_v4 = vmul.f32 %v818_v46, %v210_v28 }
  0x50   :  { %v215_v29 = vmul.f32 %v823_v47, %v210_v28  ;;  %v200_v5 = vadd.f32 %v193_v37, %v177_v16  ;;  %v201_v30 = vadd.f32 %v194_v17, %v178_v61  ;;  %v216_v42 = vmul.f32 %v828_v50, %v210_v28  ;;  %v1193_v16 = vld [vmem:[#allocation10_spill] sm:$0xff]  ;;  %v1194_v61 = vld [vmem:[#allocation11_spill] sm:$0xff]  ;;  %v1196_v17 = vld [vmem:[#allocation13_spill] sm:$0xff] }
  0x51   :  { %v217_v34 = vmul.f32 %v833_v51, %v210_v28  ;;  %v1038_v38 = vadd.f32 %v456_v53, %v440_v7  ;;  %v1040_v59 = vadd.f32 %v457_v62, %v441_v35  ;;  %v161_v9 = vstv %s1004_s26 }
  0x52   :  { %v233_v39 = vstv %s1011_s27  ;;  %v1044_v40 = vadd.f32 %v458_v15, %v442_v41  ;;  %v1046_v45 = vadd.f32 %v459_v36, %v443_v60  ;;  %v218_v46 = vadd.f32 %v211_v49, %v195_v11  ;;  %v1197_v49 = vld [vmem:[#allocation14_spill] sm:$0xff] }
  0x53   :  { %v219_v47 = vadd.f32 %v212_v23, %v196_v22  ;;  %v220_v50 = vadd.f32 %v213_v56, %v197_v52  ;;  %v221_v8 = vadd.f32 %v214_v4, %v198_v24  ;;  %v222_v51 = vadd.f32 %v215_v29, %v199_v10  ;;  %v1198_v22 = vld [vmem:[#allocation15_spill] sm:$0xff]  ;;  %v1199_v24 = vld [vmem:[#allocation16_spill] sm:$0xff]  ;;  %v1200_v23 = vld [vmem:[#allocation17_spill] sm:$0xff] }
  0x54   :  { %v223_v53 = vadd.f32 %v216_v42, %v200_v5  ;;  %v224_v35 = vadd.f32 %v217_v34, %v201_v30  ;;  %v234_v62 = vmul.f32 %v847_v0, %v233_v39  ;;  %v1191_v28 = vstv %s747_s29  ;;  %v1201_v10 = vld [vmem:[#allocation18_spill] sm:$0xff] }
  0x55   :  { %v235_v41 = vmul.f32 %v852_v1, %v233_v39  ;;  %v236_v60 = vmul.f32 %v859_v6, %v233_v39  ;;  %v237_v15 = vmul.f32 %v866_v26, %v233_v39  ;;  %v1192_v54 = vstv %s886_s20 }
  0x56   :  { %v238_v36 = vmul.f32 %v873_v31, %v233_v39  ;;  %v239_v13 = vmul.f32 %v878_v32, %v233_v39  ;;  %v240_v14 = vmul.f32 %v883_v33, %v233_v39  ;;  %v1202_v34 = vstv %s918_s23 }
  0x57   :  { %v242_v30 = vadd.f32 %v235_v41, %v219_v47  ;;  %v243_v42 = vadd.f32 %v236_v60, %v220_v50 }
  0xa8   :  { %v268_v25 = vpop.xlane.xlu1 %267 }
  0xa9   :  { %v269_v44 = vmul.f32 0.0051020407, %v268_v25  ;;  %v46_v48 = vpop.xlane.xlu0 %45  ;;  %v244_v25 = vadd.f32 %v237_v15, %v221_v8 }
  0xaa   :  { %v47_v7 = vmul.f32 0.0051020407, %v46_v48 }
  0xab   :  { %v272_v18 = vadd.f32 %v1191_v28, %v269_v44  ;;  %v245_v44 = vadd.f32 %v238_v36, %v222_v51  ;;  %v247_v28 = vadd.f32 %v240_v14, %v224_v35 }
  0xac   :  { %v50_v3 = vadd.f32 %v1192_v54, %v47_v7  ;;  %v378_v11 = vpop.xlane.xlu1 %377  ;;  %v246_v7 = vadd.f32 %v239_v13, %v223_v53 }
  0xad   :  { %v358_v43 = vadd.f32 %v1193_v16, %v272_v18  ;;  %v359_v0 = vadd.f32 %v1194_v61, %v272_v18  ;;  %v360_v37 = vadd.f32 %v1195_v19, %v272_v18  ;;  %v361_v1 = vadd.f32 %v1196_v17, %v272_v18  ;;  %v158_v6 = vpop.xlane.xlu0 %157 }
  0xae   :  { %v362_v26 = vadd.f32 %v1197_v49, %v272_v18  ;;  %v363_v52 = vadd.f32 %v1198_v22, %v272_v18  ;;  %v364_v31 = vadd.f32 %v1199_v24, %v272_v18  ;;  %v139_v32 = vadd.f32 %v1200_v23, %v50_v3 }
  0xaf   :  { %576 = vst [vmem:[%s1173_s4 + $0x70] sm:$0xff] %v358_v43  ;;  %577 = vst [vmem:[%s1173_s4 + $0x78] sm:$0xff] %v359_v0  ;;  %v140_v33 = vadd.f32 %v973_v55, %v50_v3  ;;  %v141_v56 = vadd.f32 %v1201_v10, %v50_v3  ;;  %v142_v4 = vadd.f32 %v986_v57, %v50_v3  ;;  %v379_v57 = vmul.f32 0.0051020407, %v378_v11 }
  0xb0   :  { %578 = vst [vmem:[%s1173_s4 + $0x80] sm:$0xff] %v360_v37  ;;  %579 = vst [vmem:[%s1173_s4 + $0x88] sm:$0xff] %v361_v1  ;;  %v143_v29 = vadd.f32 %v988_v58, %v50_v3  ;;  %v144_v55 = vadd.f32 %v990_v63, %v50_v3  ;;  %v145_v5 = vadd.f32 %v993_v27, %v50_v3  ;;  %v159_v58 = vmul.f32 0.0051020407, %v158_v6 }
  0xb1   :  { %580 = vst [vmem:[%s1173_s4 + $0x90] sm:$0xff] %v362_v26  ;;  %581 = vst [vmem:[%s1173_s4 + $0x98] sm:$0xff] %v363_v52  ;;  %v467_v63 = vadd.f32 %v1019_v12, %v997_v2  ;;  %v241_v27 = vadd.f32 %v234_v62, %v218_v46  ;;  %v382_v39 = vadd.f32 %v1202_v34, %v379_v57 }
  0xb2   :  { %582 = vst [vmem:[%s1173_s4 + $0xa0] sm:$0xff] %v364_v31  ;;  %146 = vst [vmem:[%s1173_s4] sm:$0xff] %v139_v32  ;;  %v162_v48 = vadd.f32 %v161_v9, %v159_v58 }
  0xb3   :  { %147 = vst [vmem:[%s1173_s4 + $0x8] sm:$0xff] %v140_v33  ;;  %148 = vst [vmem:[%s1173_s4 + $0x10] sm:$0xff] %v141_v56  ;;  %v468_v2 = vadd.f32 %v1027_v20, %v382_v39  ;;  %v469_v12 = vadd.f32 %v1029_v21, %v382_v39  ;;  %v470_v46 = vadd.f32 %v1038_v38, %v382_v39 }
  0xb4   :  { %149 = vst [vmem:[%s1173_s4 + $0x18] sm:$0xff] %v142_v4  ;;  %150 = vst [vmem:[%s1173_s4 + $0x20] sm:$0xff] %v143_v29  ;;  %v471_v47 = vadd.f32 %v1040_v59, %v382_v39  ;;  %v472_v50 = vadd.f32 %v1044_v40, %v382_v39  ;;  %v473_v62 = vadd.f32 %v1046_v45, %v382_v39 }
  0xb5   :  { %151 = vst [vmem:[%s1173_s4 + $0x28] sm:$0xff] %v144_v55  ;;  %152 = vst [vmem:[%s1173_s4 + $0x30] sm:$0xff] %v145_v5  ;;  %v474_v18 = vadd.f32 %v467_v63, %v382_v39  ;;  %v248_v41 = vadd.f32 %v241_v27, %v162_v48  ;;  %v249_v20 = vadd.f32 %v242_v30, %v162_v48 }
  0xb6   :  { %611 = vst [vmem:[%s1173_s4 + $0xa8] sm:$0xff] %v468_v2  ;;  %612 = vst [vmem:[%s1173_s4 + $0xb0] sm:$0xff] %v469_v12  ;;  %v250_v21 = vadd.f32 %v243_v42, %v162_v48  ;;  %v251_v38 = vadd.f32 %v244_v25, %v162_v48  ;;  %v252_v59 = vadd.f32 %v245_v44, %v162_v48 }
  0xb7   :  { %613 = vst [vmem:[%s1173_s4 + $0xb8] sm:$0xff] %v470_v46  ;;  %614 = vst [vmem:[%s1173_s4 + $0xc0] sm:$0xff] %v471_v47  ;;  %v253_v9 = vadd.f32 %v246_v7, %v162_v48  ;;  %v254_v40 = vadd.f32 %v247_v28, %v162_v48 }
  0xb8   :  { %615 = vst [vmem:[%s1173_s4 + $0xc8] sm:$0xff] %v472_v50  ;;  %616 = vst [vmem:[%s1173_s4 + $0xd0] sm:$0xff] %v473_v62 }
  0xb9   :  { %617 = vst [vmem:[%s1173_s4 + $0xd8] sm:$0xff] %v474_v18  ;;  %541 = vst [vmem:[%s1173_s4 + $0x38] sm:$0xff] %v248_v41 }
  0xba   :  { %542 = vst [vmem:[%s1173_s4 + $0x40] sm:$0xff] %v249_v20  ;;  %543 = vst [vmem:[%s1173_s4 + $0x48] sm:$0xff] %v250_v21 }
  0xbb   :  { %544 = vst [vmem:[%s1173_s4 + $0x50] sm:$0xff] %v251_v38  ;;  %545 = vst [vmem:[%s1173_s4 + $0x58] sm:$0xff] %v252_v59 }
  0xbc   :  { %546 = vst [vmem:[%s1173_s4 + $0x60] sm:$0xff] %v253_v9  ;;  %547 = vst [vmem:[%s1173_s4 + $0x68] sm:$0xff] %v254_v40 }
  0xbd   :  { %487 = vsyncpa [#allocation3], 1 }
  0xbe   :  { %488 = vsyncpa [#allocation5], 1 }

</bundles_post_ra>
